<compile_context>
chip_gen: v7x
topology: tpu7x:2x2x1
jax: 0.10.0
libtpu: 0.0.40
codegen_flags: <defaults>
</compile_context>

<pallas_src>
import functools

import jax
import jax.numpy as jnp
from jax import lax
from jax.experimental import pallas as pl
from jax.experimental.pallas import tpu as pltpu


def _round_up(x, m):
    return ((x + m - 1) // m) * m


_VMEM_LIMIT = 64 * 1024 * 1024  # raise above the 16/32 MiB scoped defaults


# ----------------------------------------------------------------------------
# Conv-branch kernels
# ----------------------------------------------------------------------------
def _text_branch_kernel(hs_pad_ref, w1_ref, b1_ref, w2_ref, b2_ref, o_ref):
    """hs -> relu(conv1d_k3) -> conv1d_k1.  One batch element per grid step."""
    T = o_ref.shape[1]
    x = hs_pad_ref[0]                                   # (T+2, adim)
    h = jnp.dot(x[0:T], w1_ref[0], preferred_element_type=jnp.float32)
    h += jnp.dot(x[1:T + 1], w1_ref[1], preferred_element_type=jnp.float32)
    h += jnp.dot(x[2:T + 2], w1_ref[2], preferred_element_type=jnp.float32)
    h = jnp.maximum(h + b1_ref[...], 0.0)               # ReLU(t_conv1)
    y = jnp.dot(h, w2_ref[...], preferred_element_type=jnp.float32) + b2_ref[...]
    o_ref[0] = y                                        # t_conv2 (k=1)


def _mel_branch_kernel(ys_pad_ref, w1_ref, b1_ref, w2_ref, b2_ref,
                       w3_ref, b3_ref, o_ref, pad_scratch):
    """ys -> relu(conv_k3) -> relu(conv_k3) -> conv_k1.  One batch per step."""
    T = o_ref.shape[1]
    x = ys_pad_ref[0]                                   # (T+2, odim)

    h1 = jnp.dot(x[0:T], w1_ref[0], preferred_element_type=jnp.float32)
    h1 += jnp.dot(x[1:T + 1], w1_ref[1], preferred_element_type=jnp.float32)
    h1 += jnp.dot(x[2:T + 2], w1_ref[2], preferred_element_type=jnp.float32)
    h1 = jnp.maximum(h1 + b1_ref[...], 0.0)             # ReLU(m_conv1)

    # Zero only the two boundary rows of the scratch (instead of a full
    # zero-fill), then place h1 at rows [1, T+1) for the second k=3 conv.
    zero_row = jnp.zeros((1, pad_scratch.shape[1]), pad_scratch.dtype)
    pad_scratch[pl.ds(0, 1), :] = zero_row
    pad_scratch[pl.ds(T + 1, 1), :] = zero_row
    pad_scratch[pl.ds(1, T), :] = h1
    hp = pad_scratch[...]                               # (T+2, adim)

    h2 = jnp.dot(hp[0:T], w2_ref[0], preferred_element_type=jnp.float32)
    h2 += jnp.dot(hp[1:T + 1], w2_ref[1], preferred_element_type=jnp.float32)
    h2 += jnp.dot(hp[2:T + 2], w2_ref[2], preferred_element_type=jnp.float32)
    h2 = jnp.maximum(h2 + b2_ref[...], 0.0)             # ReLU(m_conv2)

    y = jnp.dot(h2, w3_ref[...], preferred_element_type=jnp.float32) + b3_ref[...]
    o_ref[0] = y                                        # m_conv3 (k=1)


# ----------------------------------------------------------------------------
# Attention kernels (distance via Gram matrix on the MXU, Tm-tiled)
# ----------------------------------------------------------------------------
def _dist_scores(y, h, hn):
    """-||y_i - h_j||_2 for a (tm, adim) x (Tt_pad, adim) tile."""
    yn = jnp.sum(y * y, axis=-1, keepdims=True)          # (tm, 1)
    # y @ h.T on the MXU (contract the lane/adim axis of both operands).
    g = lax.dot_general(y, h, dimension_numbers=(((1,), (1,)), ((), ())),
                        preferred_element_type=jnp.float32)   # (tm, Tt_pad)
    d2 = jnp.maximum(yn + hn - 2.0 * g, 0.0)              # clamp fp cancellation
    return -jnp.sqrt(d2)


def _log_softmax_store(score, o_ref):
    m = jnp.max(score, axis=-1, keepdims=True)
    s = score - m
    p = jnp.exp(s)                                        # single EUP exp pass
    lse = jnp.log(jnp.sum(p, axis=-1, keepdims=True))
    o_ref[0] = s - lse


def _attn_kernel_nomask(ys_ref, hs_ref, hn_ref, o_ref, *, tt_valid):
    score = _dist_scores(ys_ref[0], hs_ref[0], hn_ref[0])  # (tm, Tt_pad)
    col = lax.broadcasted_iota(jnp.int32, score.shape, 1)
    score = jnp.where(col < tt_valid, score, -jnp.inf)     # mask Tt padding
    _log_softmax_store(score, o_ref)


def _attn_kernel_mask(ys_ref, hs_ref, hn_ref, mask_ref, o_ref):
    score = _dist_scores(ys_ref[0], hs_ref[0], hn_ref[0])  # (tm, Tt_pad)
    # mask is int8, padded with 1 over both Tm and Tt padding.
    score = jnp.where(mask_ref[0] != 0, -jnp.inf, score)
    _log_softmax_store(score, o_ref)


# ----------------------------------------------------------------------------
# Wrapper
# ----------------------------------------------------------------------------
def text_mel_attention(params, hs, ys, mask=None):
    """hs: (B, T_text, adim) f32; ys: (B, T_mel, odim) f32;
    mask: optional (B, T_mel, T_text) bool; returns (B, T_mel, T_text) f32."""
    B, Tt, adim = hs.shape
    _, Tm, odim = ys.shape

    hs_pad = jnp.pad(hs, ((0, 0), (1, 1), (0, 0)))
    ys_pad = jnp.pad(ys, ((0, 0), (1, 1), (0, 0)))

    cp_branch = pltpu.CompilerParams(dimension_semantics=("parallel",),
                                     vmem_limit_bytes=_VMEM_LIMIT)

    # ---- text branch ----
    hs_feat = pl.pallas_call(
        _text_branch_kernel,
        out_shape=jax.ShapeDtypeStruct((B, Tt, adim), jnp.float32),
        grid=(B,),
        in_specs=[
            pl.BlockSpec((1, Tt + 2, adim), lambda b: (b, 0, 0)),
            pl.BlockSpec((3, adim, adim), lambda b: (0, 0, 0)),
            pl.BlockSpec((1, adim), lambda b: (0, 0)),
            pl.BlockSpec((adim, adim), lambda b: (0, 0)),
            pl.BlockSpec((1, adim), lambda b: (0, 0)),
        ],
        out_specs=pl.BlockSpec((1, Tt, adim), lambda b: (b, 0, 0)),
        compiler_params=cp_branch,
    )(hs_pad, params["t_w1"], params["t_b1"].reshape(1, adim),
      params["t_w2"], params["t_b2"].reshape(1, adim))

    # ---- mel branch ----
    ys_feat = pl.pallas_call(
        _mel_branch_kernel,
        out_shape=jax.ShapeDtypeStruct((B, Tm, adim), jnp.float32),
        grid=(B,),
        in_specs=[
            pl.BlockSpec((1, Tm + 2, odim), lambda b: (b, 0, 0)),
            pl.BlockSpec((3, odim, adim), lambda b: (0, 0, 0)),
            pl.BlockSpec((1, adim), lambda b: (0, 0)),
            pl.BlockSpec((3, adim, adim), lambda b: (0, 0, 0)),
            pl.BlockSpec((1, adim), lambda b: (0, 0)),
            pl.BlockSpec((adim, adim), lambda b: (0, 0)),
            pl.BlockSpec((1, adim), lambda b: (0, 0)),
        ],
        out_specs=pl.BlockSpec((1, Tm, adim), lambda b: (b, 0, 0)),
        scratch_shapes=[pltpu.VMEM((Tm + 2, adim), jnp.float32)],
        compiler_params=cp_branch,
    )(ys_pad, params["m_w1"], params["m_b1"].reshape(1, adim),
      params["m_w2"], params["m_b2"].reshape(1, adim),
      params["m_w3"], params["m_b3"].reshape(1, adim))

    # ---- pairwise distance + masked log-softmax (Tm-tiled, lane-dense Tt) ----
    tm = min(256, _round_up(Tm, 8))
    Tm_pad = _round_up(Tm, tm)
    Tt_pad = _round_up(Tt, 128)

    ys_feat_p = jnp.pad(ys_feat, ((0, 0), (0, Tm_pad - Tm), (0, 0)))
    hs_feat_p = jnp.pad(hs_feat, ((0, 0), (0, Tt_pad - Tt), (0, 0)))
    # ||h||^2 precomputed once per batch (not per Tm tile): (B, 1, Tt_pad).
    h_norm2 = jnp.sum(hs_feat_p * hs_feat_p, axis=-1)[:, None, :]

    grid = (B, Tm_pad // tm)
    y_spec = pl.BlockSpec((1, tm, adim), lambda b, i: (b, i, 0))
    h_spec = pl.BlockSpec((1, Tt_pad, adim), lambda b, i: (b, 0, 0))
    n_spec = pl.BlockSpec((1, 1, Tt_pad), lambda b, i: (b, 0, 0))
    o_spec = pl.BlockSpec((1, tm, Tt_pad), lambda b, i: (b, i, 0))
    out_shape = jax.ShapeDtypeStruct((B, Tm_pad, Tt_pad), jnp.float32)
    cp_attn = pltpu.CompilerParams(dimension_semantics=("parallel", "parallel"),
                                   vmem_limit_bytes=_VMEM_LIMIT)

    if mask is None:
        log_p = pl.pallas_call(
            functools.partial(_attn_kernel_nomask, tt_valid=Tt),
            out_shape=out_shape,
            grid=grid,
            in_specs=[y_spec, h_spec, n_spec],
            out_specs=o_spec,
            compiler_params=cp_attn,
        )(ys_feat_p, hs_feat_p, h_norm2)
    else:
        mask_i8 = jnp.pad(mask.astype(jnp.int8),
                          ((0, 0), (0, Tm_pad - Tm), (0, Tt_pad - Tt)),
                          constant_values=1)
        m_spec = pl.BlockSpec((1, tm, Tt_pad), lambda b, i: (b, i, 0))
        log_p = pl.pallas_call(
            _attn_kernel_mask,
            out_shape=out_shape,
            grid=grid,
            in_specs=[y_spec, h_spec, n_spec, m_spec],
            out_specs=o_spec,
            compiler_params=cp_attn,
        )(ys_feat_p, hs_feat_p, h_norm2, mask_i8)

    return log_p[:, :Tm, :Tt]


# ----------------------------------------------------------------------------
# Pure-JAX reference (independent path, via lax.conv_general_dilated)
# ----------------------------------------------------------------------------
def reference_forward(params, hs, ys, mask=None):
    dn = ("NWC", "WIO", "NWC")  # weights stored as (K, Cin, Cout)

    def conv(x, w, b, pad):
        y = lax.conv_general_dilated(x, w, window_strides=(1,),
                                     padding=[(pad, pad)],
                                     dimension_numbers=dn)
        return y + b[None, None, :]

    adim = params["t_b1"].shape[0]
    h = jax.nn.relu(conv(hs, params["t_w1"], params["t_b1"], 1))
    h = conv(h, params["t_w2"].reshape(1, adim, adim), params["t_b2"], 0)
    y = jax.nn.relu(conv(ys, params["m_w1"], params["m_b1"], 1))
    y = jax.nn.relu(conv(y, params["m_w2"], params["m_b2"], 1))
    y = conv(y, params["m_w3"].reshape(1, adim, adim), params["m_b3"], 0)
    diff = y[:, :, None, :] - h[:, None, :, :]
    dist = jnp.sqrt(jnp.sum(diff * diff, axis=-1))
    score = -dist
    if mask is not None:
        score = jnp.where(mask, -jnp.inf, score)
    return jax.nn.log_softmax(score, axis=-1)


# ----------------------------------------------------------------------------
def make_params(key, adim, odim):
    ks = jax.random.split(key, 10)
    s = 0.1
    return {
        "t_w1": s * jax.random.normal(ks[0], (3, adim, adim), jnp.float32),
        "t_b1": s * jax.random.normal(ks[1], (adim,), jnp.float32),
        "t_w2": s * jax.random.normal(ks[2], (adim, adim), jnp.float32),
        "t_b2": s * jax.random.normal(ks[3], (adim,), jnp.float32),
        "m_w1": s * jax.random.normal(ks[4], (3, odim, adim), jnp.float32),
        "m_b1": s * jax.random.normal(ks[5], (adim,), jnp.float32),
        "m_w2": s * jax.random.normal(ks[6], (3, adim, adim), jnp.float32),
        "m_b2": s * jax.random.normal(ks[7], (adim,), jnp.float32),
        "m_w3": s * jax.random.normal(ks[8], (adim, adim), jnp.float32),
        "m_b3": s * jax.random.normal(ks[9], (adim,), jnp.float32),
    }


if __name__ == "__main__":
    B, T_text, T_mel, adim, odim = 2, 8, 16, 32, 16
    key = jax.random.PRNGKey(0)
    k_h, k_y, k_p = jax.random.split(key, 3)

    hs = jax.random.normal(k_h, (B, T_text, adim), jnp.float32)
    ys = jax.random.normal(k_y, (B, T_mel, odim), jnp.float32)
    params = make_params(k_p, adim, odim)

    # --- no-mask case ---
    out = jax.block_until_ready(text_mel_attention(params, hs, ys, mask=None))
    ref = reference_forward(params, hs, ys, mask=None)
    assert out.shape == (B, T_mel, T_text)
    assert jnp.allclose(out, ref, atol=1e-4, rtol=1e-4), "mismatch (no mask)"

    # --- masked case (no fully-masked rows, so no NaN rows) ---
    mask = jnp.zeros((B, T_mel, T_text), dtype=bool)
    mask = mask.at[1, :, T_text - 3:].set(True)
    out_m = jax.block_until_ready(text_mel_attention(params, hs, ys, mask=mask))
    ref_m = reference_forward(params, hs, ys, mask=mask)
    finite_ok = jnp.allclose(jnp.where(mask, 0.0, out_m),
                             jnp.where(mask, 0.0, ref_m),
                             atol=1e-4, rtol=1e-4)
    inf_ok = bool(jnp.all(jnp.where(mask, out_m == -jnp.inf, True)))
    assert finite_ok and inf_ok, "mismatch (masked)"

    print("KERNEL_OK")
</pallas_src>

<mosaic_0001>
module attributes {stable_mosaic.version = 11 : i64} {
  func.func @_text_branch_kernel(%arg0: i32, %arg1: memref<1x10x32xf32, #tpu.memory_space<vmem>>, %arg2: memref<3x32x32xf32, #tpu.memory_space<vmem>>, %arg3: memref<1x32xf32, #tpu.memory_space<vmem>>, %arg4: memref<32x32xf32, #tpu.memory_space<vmem>>, %arg5: memref<1x32xf32, #tpu.memory_space<vmem>>, %arg6: memref<1x8x32xf32, #tpu.memory_space<vmem>>) attributes {dimension_semantics = [#tpu.dimension_semantics<parallel>], iteration_bounds = array<i64: 2>, scalar_prefetch = 0 : i64, scratch_operands = 0 : i64, tpu.core_type = #tpu.core_type<tc>, window_params = [{transform_indices = @transform_0, window_bounds = array<i64: 1, 10, 32>}, {pipeline_mode = #tpu.pipeline_mode<synchronous>, transform_indices = @transform_1, window_bounds = array<i64: 3, 32, 32>}, {pipeline_mode = #tpu.pipeline_mode<synchronous>, transform_indices = @transform_2, window_bounds = array<i64: 1, 32>}, {pipeline_mode = #tpu.pipeline_mode<synchronous>, transform_indices = @transform_3, window_bounds = array<i64: 32, 32>}, {pipeline_mode = #tpu.pipeline_mode<synchronous>, transform_indices = @transform_4, window_bounds = array<i64: 1, 32>}, {transform_indices = @transform_5, window_bounds = array<i64: 1, 8, 32>}]} {
    %c0 = arith.constant 0 : index
    %c0_0 = arith.constant 0 : index
    %c0_1 = arith.constant 0 : index
    %0 = vector.load %arg1[%c0, %c0_0, %c0_1] : memref<1x10x32xf32, #tpu.memory_space<vmem>>, vector<1x10x32xf32>
    %1 = vector.shape_cast %0 : vector<1x10x32xf32> to vector<10x32xf32>
    %2 = vector.extract_strided_slice %1 {offsets = [0, 0], sizes = [8, 32], strides = [1, 1]} : vector<10x32xf32> to vector<8x32xf32>
    %c0_2 = arith.constant 0 : index
    %c0_3 = arith.constant 0 : index
    %c0_4 = arith.constant 0 : index
    %3 = vector.load %arg2[%c0_2, %c0_3, %c0_4] : memref<3x32x32xf32, #tpu.memory_space<vmem>>, vector<1x32x32xf32>
    %4 = vector.shape_cast %3 : vector<1x32x32xf32> to vector<32x32xf32>
    %cst = arith.constant dense<0.000000e+00> : vector<8x32xf32>
    %5 = tpu.matmul %2, %4, %cst {dimension_numbers = #tpu.dot_dimension_numbers<[1], [0], [0], [1], [0, 0, 1, 1], [], []>} : vector<8x32xf32>, vector<32x32xf32>, vector<8x32xf32> -> vector<8x32xf32>
    %6 = vector.extract_strided_slice %1 {offsets = [1, 0], sizes = [8, 32], strides = [1, 1]} : vector<10x32xf32> to vector<8x32xf32>
    %c1 = arith.constant 1 : index
    %c0_5 = arith.constant 0 : index
    %c0_6 = arith.constant 0 : index
    %7 = vector.load %arg2[%c1, %c0_5, %c0_6] : memref<3x32x32xf32, #tpu.memory_space<vmem>>, vector<1x32x32xf32>
    %8 = vector.shape_cast %7 : vector<1x32x32xf32> to vector<32x32xf32>
    %cst_7 = arith.constant dense<0.000000e+00> : vector<8x32xf32>
    %9 = tpu.matmul %6, %8, %cst_7 {dimension_numbers = #tpu.dot_dimension_numbers<[1], [0], [0], [1], [0, 0, 1, 1], [], []>} : vector<8x32xf32>, vector<32x32xf32>, vector<8x32xf32> -> vector<8x32xf32>
    %10 = arith.addf %5, %9 : vector<8x32xf32>
    %11 = vector.extract_strided_slice %1 {offsets = [2, 0], sizes = [8, 32], strides = [1, 1]} : vector<10x32xf32> to vector<8x32xf32>
    %c2 = arith.constant 2 : index
    %c0_8 = arith.constant 0 : index
    %c0_9 = arith.constant 0 : index
    %12 = vector.load %arg2[%c2, %c0_8, %c0_9] : memref<3x32x32xf32, #tpu.memory_space<vmem>>, vector<1x32x32xf32>
    %13 = vector.shape_cast %12 : vector<1x32x32xf32> to vector<32x32xf32>
    %cst_10 = arith.constant dense<0.000000e+00> : vector<8x32xf32>
    %14 = tpu.matmul %11, %13, %cst_10 {dimension_numbers = #tpu.dot_dimension_numbers<[1], [0], [0], [1], [0, 0, 1, 1], [], []>} : vector<8x32xf32>, vector<32x32xf32>, vector<8x32xf32> -> vector<8x32xf32>
    %15 = arith.addf %10, %14 : vector<8x32xf32>
    %c0_11 = arith.constant 0 : index
    %c0_12 = arith.constant 0 : index
    %16 = vector.load %arg3[%c0_11, %c0_12] : memref<1x32xf32, #tpu.memory_space<vmem>>, vector<1x32xf32>
    %17 = vector.broadcast %16 : vector<1x32xf32> to vector<8x32xf32>
    %18 = arith.addf %15, %17 : vector<8x32xf32>
    %cst_13 = arith.constant 0.000000e+00 : f32
    %19 = vector.broadcast %cst_13 : f32 to vector<8x32xf32>
    %20 = arith.maximumf %18, %19 : vector<8x32xf32>
    %c0_14 = arith.constant 0 : index
    %c0_15 = arith.constant 0 : index
    %21 = vector.load %arg4[%c0_14, %c0_15] : memref<32x32xf32, #tpu.memory_space<vmem>>, vector<32x32xf32>
    %cst_16 = arith.constant dense<0.000000e+00> : vector<8x32xf32>
    %22 = tpu.matmul %20, %21, %cst_16 {dimension_numbers = #tpu.dot_dimension_numbers<[1], [0], [0], [1], [0, 0, 1, 1], [], []>} : vector<8x32xf32>, vector<32x32xf32>, vector<8x32xf32> -> vector<8x32xf32>
    %c0_17 = arith.constant 0 : index
    %c0_18 = arith.constant 0 : index
    %23 = vector.load %arg5[%c0_17, %c0_18] : memref<1x32xf32, #tpu.memory_space<vmem>>, vector<1x32xf32>
    %24 = vector.broadcast %23 : vector<1x32xf32> to vector<8x32xf32>
    %25 = arith.addf %22, %24 : vector<8x32xf32>
    %c0_19 = arith.constant 0 : index
    %c0_20 = arith.constant 0 : index
    %c0_21 = arith.constant 0 : index
    %26 = vector.load %arg6[%c0_19, %c0_20, %c0_21] : memref<1x8x32xf32, #tpu.memory_space<vmem>>, vector<1x8x32xf32>
    %27 = vector.shape_cast %26 : vector<1x8x32xf32> to vector<8x32xf32>
    %28 = vector.shape_cast %25 : vector<8x32xf32> to vector<1x8x32xf32>
    tpu.vector_store %arg6[%c0_19, %c0_20, %c0_21], %28 {strides = array<i32>} : memref<1x8x32xf32, #tpu.memory_space<vmem>>, vector<1x8x32xf32>,
    return
  }
  func.func @transform_0(%arg0: i32) -> (i32, i32, i32) {
    %c0_i32 = arith.constant 0 : i32
    %c0_i32_0 = arith.constant 0 : i32
    %c0_i32_1 = arith.constant 0 : i32
    return %arg0, %c0_i32, %c0_i32_0 : i32, i32, i32
  }
  func.func @transform_1(%arg0: i32) -> (i32, i32, i32) {
    %c0_i32 = arith.constant 0 : i32
    %c0_i32_0 = arith.constant 0 : i32
    %c0_i32_1 = arith.constant 0 : i32
    %c0_i32_2 = arith.constant 0 : i32
    return %c0_i32, %c0_i32_0, %c0_i32_1 : i32, i32, i32
  }
  func.func @transform_2(%arg0: i32) -> (i32, i32) {
    %c0_i32 = arith.constant 0 : i32
    %c0_i32_0 = arith.constant 0 : i32
    %c0_i32_1 = arith.constant 0 : i32
    return %c0_i32, %c0_i32_0 : i32, i32
  }
  func.func @transform_3(%arg0: i32) -> (i32, i32) {
    %c0_i32 = arith.constant 0 : i32
    %c0_i32_0 = arith.constant 0 : i32
    %c0_i32_1 = arith.constant 0 : i32
    return %c0_i32, %c0_i32_0 : i32, i32
  }
  func.func @transform_4(%arg0: i32) -> (i32, i32) {
    %c0_i32 = arith.constant 0 : i32
    %c0_i32_0 = arith.constant 0 : i32
    %c0_i32_1 = arith.constant 0 : i32
    return %c0_i32, %c0_i32_0 : i32, i32
  }
  func.func @transform_5(%arg0: i32) -> (i32, i32, i32) {
    %c0_i32 = arith.constant 0 : i32
    %c0_i32_0 = arith.constant 0 : i32
    %c0_i32_1 = arith.constant 0 : i32
    return %arg0, %c0_i32, %c0_i32_0 : i32, i32, i32
  }
}

</mosaic_0001>

<bundles_post_ra>
// kernel: tpu_custom_call.1
= control target key start
LH: loop header
LB: loop body
LE: loop exit
PB: predicated region body
PF: predicated region fallthrough
CT: control target
= control target key end

     0   :  { %10 = vsyncpa [#allocation3], 0  ;;  %s1518_s0 = inlined_call_operand.hbm [shape: f32[2,10,32], index: 0, kind: input, shape index: {}]   ;;  %s1519_s1 = inlined_call_operand.hbm [shape: f32[3,32,32], index: 1, kind: input, shape index: {}]   ;;  %s1520_s2 = inlined_call_operand.hbm [shape: f32[1,32], index: 2, kind: input, shape index: {}]   ;;  %s1521_s3 = inlined_call_operand.hbm [shape: f32[32,32], index: 3, kind: input, shape index: {}]   ;;  %s1522_s4 = inlined_call_operand.hbm [shape: f32[1,32], index: 4, kind: input, shape index: {}]   ;;  %s1523_s5 = inlined_call_operand.hbm [shape: f32[2,8,32], index: 5, kind: output, shape index: {}]  }
   0x1   :  { %12 = vsyncpa [#allocation3 + $0x1], 0 }
   0x2   :  { %13 = vsyncpa [#allocation6], 0 }
   0x3   :  { %14 = vsyncpa [#allocation9], 0 }
   0x4   :  { %15 = vsyncpa [#allocation4], 0 }
   0x5   :  { %17 = vsyncpa [#allocation4 + $0x1], 0  ;;  %s1224_s18 = smov 0   ;;  %s1226_s19 = smov 0  }
   0x6   :  { %s1228_s20 = smov 0   ;;  %s1230_s21 = smov 0  }
   0x7 LB: > { %s1245_s22 = sadd.s32 4294967295, %s1181_s21   ;;  %s757_s23 = sadd.s32 4294967294, %s1181_s21   ;;  %s1181_s21 = sphi %s1230_s21, %s1546_s21   ;;  %s1177_s20 = sphi %s1228_s20, %s1545_s20   ;;  %s1173_s19 = sphi %s1226_s19, %s1544_s19   ;;  %s1169_s18 = sphi %s1224_s18, %s1543_s18  }
   0x8   : > { %p43_p0 = scmp.ne.s32.totalorder %s1173_s19, %s1169_s18  ;;  %p1524_p1 = scmp.eq.s32.totalorder %s1245_s22, 0 }
   0x9   : > { %p157_p3 = scmp.eq.s32.totalorder %s757_s23, 1  ;;  %p758_p5 = scmp.ge.s32.totalorder %s1181_s21, 1 }
   0xa   : > { %p1254_p4 = por %p1524_p1, %p43_p0  ;;  %p164_p7 = scmp.lt.s32.totalorder %s1181_s21, 3 }
   0xb   : > { %p1259_p6 = por %p157_p3, %p43_p0  ;;  %s1183_s27 = smov [#allocation5]  }
   0xc   : > { %s1527_s24 = scalar_select %p1254_p4, 1, 0 }
   0xd   : > { %s1528_s25 = scalar_select %p1259_p6, 1, 0 }
   0xe   : > { %p1264_p8 = pnand %p758_p5, %p164_p7  ;;  %s176_s28 = sshll.u32 %s1183_s27, 4  ;;  %s1268_s28 = int_to_ptr.vmem [resolvable:$true] %s176_s28 }
   0xf   : > { %s1184_s30 = smov [#allocation8]   ;;  %s1185_s7 = smov [#allocation7]  }
  0x10   : > { %s1529_s26 = scalar_select %p1264_p8, 1, 0 }
  0x11   : > { %p893_p9 = pneg %p1264_p8  ;;  %s200_s6 = sshll.u32 %s1184_s30, 4  ;;  %s1279_s6 = int_to_ptr.vmem [resolvable:$true] %s200_s6 }
  0x12   : > { %s1281_s8 = sshll.u32 %s1185_s7, 4  ;;  %s965_s11 = scalar_lea.hbm %s1519_s1, 1536  ;;  %s191_s8 = int_to_ptr.vmem [resolvable:$true] %s1281_s8 }
  0x13   : > { %p1275_p11 = pnand %p893_p9, %p1524_p1  ;;  %p966_p12 = scmp.ne.s32.totalorder %s1519_s1, %s965_s11 }
  0x14   : > { %p972_p5 = scmp.lt.u32.totalorder %s965_s11, %s1519_s1 }
  0x15   : > { %p1291_p13 = pneg %p1275_p11 }
  0x17   : > { %p968_p0 = pnand %p1291_p13, %p966_p12 }
  0x19   : > { %p969_p3 = pneg %p968_p0 }
  0x1b   : > { %p974_p7 = pnand %p972_p5, %p969_p3 }
  0x1d   : > { %977 = shalt.err (!%p974_p7)
}
  0x1e   : > { %s978_s17 = scalar_lea.vmem %s1268_s28, 1536  ;;  %p986_p2 = scmp.lt.s32.totalorder %s1268_s28, %s1268_s28 }
  0x1f   : > { %p979_p9 = scmp.ne.s32.totalorder %s1268_s28, %s978_s17  ;;  %p987_p6 = scmp.lt.s32.totalorder %s978_s17, %s978_s17 }
  0x21   : > { %p981_p10 = pnand %p979_p9, %p1291_p13  ;;  %p988_p12 = por %p987_p6, %p986_p2 }
  0x23   : > { %p982_p1 = pneg %p981_p10 }
  0x25   : > { %p989_p0 = pnand %p988_p12, %p982_p1 }
  0x27   : > { %992 = shalt.err (!%p989_p0)
}
  0x28   : > { %s1186_s23 = smov 128   ;;  %s1187_s27 = smov 8  }
  0x29   : > { %896 = dma.hbm_to_vmem [thread:$0]  (!%p1275_p11), %s1519_s1, 1536, %s1268_s28, [#allocation6], %s1186_s23, %s1186_s23, %s1187_s27  }
  0x2a   : > { %s993_s11 = scalar_lea.hbm %s1521_s3, 512 }
  0x2b   : > { %p994_p1 = scmp.ne.s32.totalorder %s1521_s3, %s993_s11  ;;  %p1000_p10 = scmp.lt.u32.totalorder %s993_s11, %s1521_s3 }
  0x2d   : > { %p996_p2 = pnand %p994_p1, %p1291_p13 }
  0x2f   : > { %p997_p6 = pneg %p996_p2 }
  0x31   : > { %p1002_p3 = pnand %p1000_p10, %p997_p6 }
  0x33   : > { %1005 = shalt.err (!%p1002_p3)
}
  0x34   : > { %s1006_s28 = scalar_lea.vmem %s1279_s6, 512  ;;  %p1014_p12 = scmp.lt.s32.totalorder %s1279_s6, %s1279_s6 }
  0x35   : > { %p1007_p5 = scmp.ne.s32.totalorder %s1279_s6, %s1006_s28  ;;  %p1015_p0 = scmp.lt.s32.totalorder %s1006_s28, %s1006_s28 }
  0x37   : > { %p1009_p7 = pnand %p1007_p5, %p1291_p13  ;;  %p1016_p1 = por %p1015_p0, %p1014_p12 }
  0x39   : > { %p1010_p9 = pneg %p1009_p7 }
  0x3b   : > { %p1017_p2 = pnand %p1016_p1, %p1010_p9 }
  0x3d   : > { %1020 = shalt.err (!%p1017_p2)
}
  0x3e   : > { %902 = dma.hbm_to_vmem [thread:$0]  (!%p1275_p11), %s1521_s3, 512, %s1279_s6, [#allocation9], %s1186_s23, %s1186_s23, %s1187_s27  }
  0x3f   : > { %s1021_s10 = scalar_lea.hbm %s1520_s2, 16 }
  0x40   : > { %p1022_p6 = scmp.ne.s32.totalorder %s1520_s2, %s1021_s10  ;;  %p1028_p5 = scmp.lt.u32.totalorder %s1021_s10, %s1520_s2 }
  0x42   : > { %p1024_p10 = pnand %p1022_p6, %p1291_p13 }
  0x44   : > { %p1025_p3 = pneg %p1024_p10 }
  0x46   : > { %p1030_p7 = pnand %p1028_p5, %p1025_p3 }
  0x48   : > { %1033 = shalt.err (!%p1030_p7)
}
  0x49   : > { %s1034_s16 = scalar_lea.vmem %s191_s8, 16  ;;  %s1041_s6 = scalar_lea.vmem %s191_s8, 32 }
  0x4a   : > { %p1035_p9 = scmp.ne.s32.totalorder %s191_s8, %s1034_s16  ;;  %p1042_p1 = scmp.lt.s32.totalorder %s191_s8, %s191_s8 }
  0x4b   : > { %p1043_p2 = scmp.lt.s32.totalorder %s1041_s6, %s1034_s16 }
  0x4c   : > { %p1037_p12 = pnand %p1035_p9, %p1291_p13 }
  0x4d   : > { %p1044_p4 = por %p1043_p2, %p1042_p1 }
  0x4e   : > { %p1038_p0 = pneg %p1037_p12 }
  0x50   : > { %p1045_p8 = pnand %p1044_p4, %p1038_p0 }
  0x52   : > { %1048 = shalt.err (!%p1045_p8)
}
  0x53   : > { %899 = dma.hbm_to_vmem [thread:$0]  (!%p1275_p11), %s1520_s2, 16, %s191_s8, [#allocation6]  }
  0x54   : > { %s1188_s30 = smov [#allocation10]   ;;  %s1049_s11 = scalar_lea.hbm %s1522_s4, 16 }
  0x55   : > { %s214_s7 = sshll.u32 %s1188_s30, 4  ;;  %p1050_p6 = scmp.ne.s32.totalorder %s1522_s4, %s1049_s11  ;;  %s215_s7 = int_to_ptr.vmem [resolvable:$true] %s214_s7 }
  0x56   : > { %p1056_p10 = scmp.lt.u32.totalorder %s1049_s11, %s1522_s4 }
  0x57   : > { %p1052_p4 = pnand %p1050_p6, %p1291_p13 }
  0x59   : > { %p1053_p8 = pneg %p1052_p4 }
  0x5b   : > { %p1058_p3 = pnand %p1056_p10, %p1053_p8 }
  0x5d   : > { %1061 = shalt.err (!%p1058_p3)
}
  0x5e   : > { %s1062_s8 = scalar_lea.vmem %s215_s7, 16  ;;  %s1069_s6 = scalar_lea.vmem %s215_s7, 32 }
  0x5f   : > { %p1063_p5 = scmp.ne.s32.totalorder %s215_s7, %s1062_s8  ;;  %p1070_p12 = scmp.lt.s32.totalorder %s215_s7, %s215_s7 }
  0x60   : > { %p1071_p0 = scmp.lt.s32.totalorder %s1069_s6, %s1062_s8 }
  0x61   : > { %p1065_p7 = pnand %p1063_p5, %p1291_p13 }
  0x62   : > { %p1072_p1 = por %p1071_p0, %p1070_p12 }
  0x63   : > { %p1066_p9 = pneg %p1065_p7 }
  0x65   : > { %p1073_p2 = pnand %p1072_p1, %p1066_p9 }
  0x67   : > { %1076 = shalt.err (!%p1073_p2)
}
  0x68   : > { %905 = dma.hbm_to_vmem [thread:$0]  (!%p1275_p11), %s1522_s4, 16, %s215_s7, [#allocation9]  }
  0x69   : > { %s1379_s14 = sadd.s32 1, %s1181_s21   ;;  %s30_s30 = sadd.s32 1, %s1177_s20 }
  0x6a   : > { %s27_s29 = ssub.s32 %s1181_s21, %s1379_s14  ;;  %p37_p13 = scmp.ne.s32.totalorder %s1177_s20, %s1173_s19 }
  0x6b   : > { %p28_p6 = scmp.eq.s32.totalorder %s27_s29, 0  ;;  %p38_p4 = scmp.eq.s32.totalorder %s1181_s21, 0 }
  0x6c   : > { %p1532_p8 = scmp.eq.s32.totalorder %s1245_s22, 1  ;;  %p918_p3 = scmp.lt.s32.totalorder %s1181_s21, 2 }
  0x6d   : > { %s1395_s10 = scalar_select %p28_p6, %s1177_s20, %s30_s30  }
  0x6e   : > { %p1389_p10 = por %p1532_p8, %p37_p13  ;;  %p39_p5 = por %p38_p4, %p37_p13 }
  0x6f   : > { %s225_s11 = sand.u32 1, %s1177_s20   ;;  %s784_s7 = sshll.u32 %s1181_s21, 8 }
  0x70   : > { %s764_s12 = sshll.u32 %s225_s11, 4  ;;  %s1402_s16 = scalar_lea.hbm %s1518_s0, %s784_s7 }
  0x71   : > { %s229_s8 = scalar_lea.vmem [#allocation2], %s764_s12  ;;  %p1406_p11 = pnand %p918_p3, %p39_p5 }
  0x72   : > { %s236_s6 = sshll.u32 %s229_s8, 4  ;;  %s1410_s17 = scalar_lea.sflag [#allocation3], %s225_s11  ;;  %s1404_s6 = int_to_ptr.vmem [resolvable:$true] %s236_s6 }
  0x73   : > { %s1077_s30 = scalar_lea.hbm %s1402_s16, 256  ;;  %p1079_p9 = pneg %p1406_p11 }
  0x74   : > { %p1078_p7 = scmp.ne.s32.totalorder %s1402_s16, %s1077_s30  ;;  %s1082_s7 = scalar_lea.hbm %s1518_s0, 512 }
  0x75   : > { %p1083_p1 = scmp.lt.u32.totalorder %s1402_s16, %s1518_s0  ;;  %p1084_p2 = scmp.lt.u32.totalorder %s1082_s7, %s1077_s30 }
  0x76   : > { %p1080_p12 = pnand %p1079_p9, %p1078_p7  ;;  %p1086_p6 = scmp.lt.u32.totalorder %s1077_s30, %s1402_s16 }
  0x77   : > { %p1085_p13 = por %p1084_p2, %p1083_p1 }
  0x78   : > { %p1081_p0 = pneg %p1080_p12 }
  0x79   : > { %p1087_p4 = por %p1086_p6, %p1085_p13 }
  0x7b   : > { %p1088_p8 = pnand %p1087_p4, %p1081_p0 }
  0x7d   : > { %1091 = shalt.err (!%p1088_p8)
}
  0x7e   : > { %s1092_s11 = scalar_lea.vmem %s1404_s6, 256  ;;  %s1189_s8 = smov [#allocation2]  }
  0x7f   : > { %p1093_p3 = scmp.ne.s32.totalorder %s1404_s6, %s1092_s11  ;;  %s1097_s29 = sshll.u32 %s1189_s8, 4  ;;  %s1098_s29 = int_to_ptr.vmem [resolvable:$false] %s1097_s29 }
  0x80   : > { %s1099_s12 = scalar_lea.vmem %s1098_s29, 512  ;;  %p1100_p12 = scmp.lt.s32.totalorder %s1404_s6, %s1098_s29 }
  0x81   : > { %p1095_p5 = pnand %p1093_p3, %p1079_p9  ;;  %p1101_p1 = scmp.lt.s32.totalorder %s1099_s12, %s1092_s11 }
  0x83   : > { %p1096_p7 = pneg %p1095_p5  ;;  %p1102_p2 = por %p1101_p1, %p1100_p12 }
  0x85   : > { %p1103_p13 = pnand %p1102_p2, %p1096_p7 }
  0x87   : > { %1106 = shalt.err (!%p1103_p13)
}
  0x88   : > { %909 = dma.hbm_to_vmem [thread:$0]  (!%p1406_p11), %s1402_s16, 256, %s1404_s6, %s1410_s17, %s1186_s23, %s1186_s23, %s1187_s27  }
  0x89   : > { %p1535_p9 = scmp.ne.s32.totalorder %s1529_s26, 0 }
  0x8a   : > { %s1444_s30 = sand.u32 (!%p1535_p9), 1, %s1173_s19   ;;  %p1536_p0 = scmp.ne.s32.totalorder (!%p1535_p9), %s1527_s24, 0 }
  0x8b   : > { %248 = sbr.rel (%p1535_p9) target bundleno = 617 (0x269), region = 40  ;;  %s768_s7 = sshll.u32 (!%p1535_p9), %s1444_s30, 4 }
  0x8c   : > { %s251_s13 = scalar_lea.sflag (!%p1535_p9), [#allocation3], %s1444_s30  ;;  %s254_s15 = scalar_lea.vmem (!%p1535_p9), [#allocation2], %s768_s7 }
  0x92   : > { %1152 = dma.done.wait (%p1536_p0), %s251_s13, 256  }
  0x93   : > { %1154 = vsyncadd (%p1536_p0), %s251_s13, 4294967040  ;;  %p1537_p6 = scmp.eq.s32.totalorder %s1245_s22, 0 }
  0x95   : > { %1156 = dma.done.wait (%p1537_p6), [#allocation6], 1552   ;;  %p1538_p11 = pmov %p1537_p6 }
  0x96   : > { %p1539_p4 = pmov %p1537_p6 }
  0x97   : > { %1158 = vsyncadd (%p1538_p11), [#allocation6], 4294965744 }
  0x98   : > { %1160 = dma.done.wait (%p1539_p4), [#allocation9], 528   ;;  %p1540_p8 = pmov %p1539_p4 }
  0x99   : > { %v1190_v0 = vmov 0.0|0.0   ;;  %vm1191_vm0 = vmmov 0   ;;  %v1192_v1 = vmov 0.0   ;;  %v304_v2 = vld [vmem:[#allocation5 + $0x20] sm:$0xff]  ;;  %v305_v3 = vld [vmem:[#allocation5 + $0x28] sm:$0xff]  ;;  %v306_v7 = vld [vmem:[#allocation5 + $0x30] sm:$0xff] }
  0x9a   : > { %1162 = vsyncadd (%p1540_p8), [#allocation9], 4294966768  ;;  %849 = vmatprep.subr.bf16.mxu0 %v1190_v0  ;;  %855 = vmatprep.subr.bf16.mxu1 %v1190_v0  ;;  %v299_v4 = vld [vmem:[#allocation5] sm:$0xff]  ;;  %v850_v5 = vpack.c.bf16 %v305_v3, %v304_v2  ;;  %v300_v6 = vld [vmem:[#allocation5 + $0x8] sm:$0xff]  ;;  %vm310_vm1 = vcmask 1046528   ;;  %vm314_vm2 = vcmask 261120  }
  0x9b   : > { %813 = vmatprep.mubr.msk.f32.mxu0 %vm1191_vm0, %v1192_v1  ;;  %824 = vmatprep.mubr.msk.f32.mxu1 %vm1191_vm0, %v1192_v1  ;;  %v307_v8 = vld [vmem:[#allocation5 + $0x38] sm:$0xff]  ;;  %v856_v9 = vpack.c.bf16 %v300_v6, %v299_v4  ;;  %v301_v10 = vld [vmem:[#allocation5 + $0x10] sm:$0xff]  ;;  %v460_v18 = vld [vmem:[#allocation5 + $0x40] sm:$0xff]  ;;  %vm464_vm3 = vcmask 1045504   ;;  %s773_s24 = sshll.u32 %s1444_s30, 3  ;;  %s781_s26 = sshll.u32 %s1245_s22, 7 }
  0x9c   : > { %v302_v11 = vld [vmem:[#allocation5 + $0x18] sm:$0xff]  ;;  %v297_v12 = vld [vmem:[%s254_s15] sm:$0xff]  ;;  %851 = vmatpush3.bf16.msra.mxu0 %v850_v5  ;;  %v853_v13 = vpack.c.bf16 %v307_v8, %v306_v7  ;;  %v461_v19 = vld [vmem:[#allocation5 + $0x48] sm:$0xff]  ;;  %s296_s23 = scalar_lea.vmem [#allocation11], %s773_s24  ;;  %s1473_s28 = scalar_lea.hbm %s1523_s5, %s781_s26 }
  0x9d   : > { %v298_v14 = vld [vmem:[%s254_s15 + $0x8] sm:$0x3]  ;;  %v311_v15 = vrot.slane %v297_v12, 1  ;;  %857 = vmatpush3.bf16.msra.mxu1 %v856_v9  ;;  %852 = vmatprep.subr.bf16.mxu0 %v1190_v0  ;;  %v859_v16 = vpack.c.bf16 %v302_v11, %v301_v10  ;;  %v862_v21 = vpack.c.bf16 %v461_v19, %v460_v18  ;;  %v462_v22 = vld [vmem:[#allocation5 + $0x50] sm:$0xff]  ;;  %v465_v26 = vrot.slane %v297_v12, 2  ;;  %v553_v32 = vld [vmem:[#allocation8 + $0x18] sm:$0xff] }
  0x9e   : > { %v312_v17 = vrot.slane %v298_v14, 1  ;;  %858 = vmatprep.subr.bf16.mxu1 %v1190_v0  ;;  %v463_v23 = vld [vmem:[#allocation5 + $0x58] sm:$0xff]  ;;  %v466_v24 = vrot.slane %v298_v14, 2  ;;  %v550_v28 = vld [vmem:[#allocation8] sm:$0xff]  ;;  %v551_v29 = vld [vmem:[#allocation8 + $0x8] sm:$0xff]  ;;  %s649_s27 = sshll.u32 %s296_s23, 4  ;;  %s1475_s27 = int_to_ptr.vmem [resolvable:$true] %s649_s27 }
  0x9f   : > { %v865_v25 = vpack.c.bf16 %v463_v23, %v462_v22  ;;  %v868_v30 = vpack.c.bf16 %v551_v29, %v550_v28  ;;  %v552_v31 = vld [vmem:[#allocation8 + $0x10] sm:$0xff]  ;;  %v777_v40 = vld [vmem:[#allocation7] ss:$0 sm:$0xff]  ;;  %v778_v45 = vld [vmem:[#allocation10] ss:$0 sm:$0xff]  ;;  %s636_s17 = scalar_lea.sflag [#allocation4], %s1444_s30 }
  0xa0   : > { %854 = vmatpush3.bf16.msra.mxu0 %v853_v13  ;;  %v313_v20 = vsel %vm310_vm1, %v311_v15, %v312_v17  ;;  %v467_v27 = vsel %vm464_vm3, %v465_v26, %v466_v24  ;;  %v871_v33 = vpack.c.bf16 %v553_v32, %v552_v31  ;;  %s1107_s11 = scalar_lea.vmem %s1475_s27, 128  ;;  %s1193_s22 = smov [#allocation11]  }
  0xa1   : > { %860 = vmatpush3.bf16.msra.mxu1 %v859_v16  ;;  %861 = vmatprep.subr.bf16.mxu0 %v1190_v0  ;;  %p1108_p3 = scmp.ne.s32.totalorder %s1475_s27, %s1107_s11  ;;  %s1111_s8 = sshll.u32 %s1193_s22, 4  ;;  %s1112_s8 = int_to_ptr.vmem [resolvable:$false] %s1111_s8 }
  0xa2   : > { %867 = vmatprep.subr.bf16.mxu1 %v1190_v0  ;;  %s1113_s29 = scalar_lea.vmem %s1112_s8, 256  ;;  %p1114_p12 = scmp.lt.s32.totalorder %s1475_s27, %s1112_s8 }
  0xa3   : > { %814 = vmatmul.mubr.msk.f32.vlgmr.msra.gmra.mrb[0].mxu0 %vm314_vm2, %v313_v20  ;;  %p1109_p5 = pnand %p1108_p3, %p1389_p10  ;;  %p1115_p1 = scmp.lt.s32.totalorder %s1113_s29, %s1107_s11 }
  0xa4   : > { %825 = vmatmul.mubr.msk.f32.vlgmr.msra.gmra.mrb[0].mxu1 %vm314_vm2, %v297_v12  ;;  %863 = vmatpush3.bf16.msra.mxu0 %v862_v21 }
  0xa5   : > { %864 = vmatprep.subr.bf16.mxu0 %v1190_v0  ;;  %835 = vmatprep.mubr.msk.f32.mxu0 %vm1191_vm0, %v1192_v1  ;;  %p1110_p7 = pneg %p1109_p5  ;;  %p1116_p2 = por %p1115_p1, %p1114_p12 }
  0xa6   : > { %846 = vmatprep.mubr.msk.f32.mxu1 %vm1191_vm0, %v1192_v1  ;;  %869 = vmatpush3.bf16.msra.mxu1 %v868_v30 }
  0xa7   : > { %870 = vmatprep.subr.bf16.mxu1 %v1190_v0  ;;  %p1117_p13 = pnand %p1116_p2, %p1110_p7 }
  0xa8   : > { %866 = vmatpush3.bf16.msra.mxu0 %v865_v25 }
  0xaa   : > { %872 = vmatpush3.bf16.msra.mxu1 %v871_v33 }
  0xab   : > { %836 = vmatmul.mubr.msk.f32.vlgmr.msra.gmra.mrb[2].mxu0 %vm314_vm2, %v467_v27 }
 0x176   : > { %v383_v34 = vpop.f32.mrb[0].mxu0 }
 0x177   : > { %v815_v35 = vpop.f32.mrb[1].mxu0  ;;  %v455_v36 = vpop.f32.mrb[0].mxu1 }
 0x178   : > { %v456_v37 = vadd.f32 %v455_v36, %v383_v34  ;;  %v826_v38 = vpop.f32.mrb[1].mxu1 }
 0x17e   : > { %v536_v39 = vpop.f32.mrb[2].mxu0 }
 0x17f   : > { %v540_v41 = vadd.f32 %v536_v39, %v456_v37  ;;  %v837_v42 = vpop.f32.mrb[3].mxu0 }
 0x181   : > { %v548_v43 = vadd.f32 %v777_v40, %v540_v41 }
 0x183   : > { %v549_v44 = vmax.f32 %v548_v43, 0.0 }
 0x185   : > { %847 = vmatmul.mubr.msk.f32.vlgmr.msra.gmra.mrb[2].mxu1 %vm314_vm2, %v549_v44 }
 0x258   : > { %v630_v46 = vpop.f32.mrb[2].mxu1 }
 0x259   : > { %v631_v47 = vadd.f32 %v778_v45, %v630_v46  ;;  %v848_v48 = vpop.f32.mrb[3].mxu1 }
 0x25b   : > { %634 = vst.msk [vmem:[%s296_s23] sm:$0xff] %vm314_vm2, %v631_v47 }
 0x25c   : > { %1120 = shalt.err (!%p1117_p13)
}
 0x25d   : > { %s1121_s12 = scalar_lea.hbm %s1473_s28, 128  ;;  %s1125_s13 = scalar_lea.hbm %s1523_s5, 256 }
 0x25e   : > { %p1122_p9 = scmp.ne.s32.totalorder %s1473_s28, %s1121_s12  ;;  %p1126_p11 = scmp.lt.u32.totalorder %s1473_s28, %s1523_s5 }
 0x25f   : > { %p1127_p4 = scmp.lt.u32.totalorder %s1125_s13, %s1121_s12  ;;  %p1129_p3 = scmp.lt.u32.totalorder %s1121_s12, %s1473_s28 }
 0x260   : > { %p1123_p0 = pnand %p1122_p9, %p1389_p10 }
 0x261   : > { %p1128_p8 = por %p1127_p4, %p1126_p11 }
 0x262   : > { %p1124_p6 = pneg %p1123_p0 }
 0x263   : > { %p1130_p5 = por %p1129_p3, %p1128_p8 }
 0x265   : > { %p1131_p7 = pnand %p1130_p5, %p1124_p6 }
 0x267   : > { %1134 = shalt.err (!%p1131_p7)
}
 0x268   : > { %891 = dma.vmem_to_hbm [thread:$0]  (%p1389_p10), %s1475_s27, 128, %s1473_s28, %s636_s17  }
 0x269 PF: > { %s661_s26 = sand.u32 1, %s1169_s18   ;;  %p1541_p12 = scmp.ne.s32.totalorder %s1528_s25, 0 }
 0x26a   : > { %p1542_p1 = scmp.ge.s32.totalorder %s1181_s21, 2  ;;  %s662_s23 = scalar_lea.sflag [#allocation4], %s661_s26 }
 0x26c   : > { %p911_p2 = pnand %p1542_p1, %p1541_p12 }
 0x26e   : > { %1164 = dma.done.wait (!%p911_p2), %s662_s23, 128  }
 0x26f   : > { %1166 = vsyncadd (!%p911_p2), %s662_s23, 4294967168  ;;  %p20_p13 = scmp.ge.s32.totalorder %s1379_s14, 4   ;;  %s1543_s18 = smov %s1173_s19 }
 0x270   : > { %s1544_s19 = smov %s1177_s20  ;;  %s1545_s20 = smov %s1395_s10 }
 0x271   : > { %s1546_s21 = smov %s1379_s14  ;;  %22 = sbr.rel (!%p20_p13) target bundleno = 7 (0x7), region = 103 }
 0x278   :  { %667 = vsyncpa [#allocation3], 1 }
 0x279   :  { %669 = vsyncpa [#allocation3 + $0x1], 1 }
 0x27a   :  { %670 = vsyncpa [#allocation6], 1 }
 0x27b   :  { %671 = vsyncpa [#allocation9], 1 }
 0x27c   :  { %672 = vsyncpa [#allocation4], 1 }
 0x27d   :  { %674 = vsyncpa [#allocation4 + $0x1], 1 }

</bundles_post_ra>
